<compile_context>
chip_gen: v7x
topology: tpu7x:2x2x1
jax: 0.10.0
libtpu: 0.0.40
codegen_flags: <defaults>
</compile_context>

<pallas_src>
import jax
import jax.numpy as jnp
from jax.experimental import pallas as pl
from jax.experimental.pallas import tpu as pltpu  # noqa: F401  (TPU backend)

B = 8          # batch
IN_DIM = 1     # Linear(1, 50) input features
HID = 50       # hidden features (logical)
HID_PAD = 128  # hidden features padded to a full lane width
OUT_DIM = 1    # Linear(50, 1) output features
SLAB_ROWS = 4 + B  # rows 0..3 = params, rows 4..4+B-1 = x (batch along sublanes)


def quadnn_kernel(slab_ref, o_ref):
    p = slab_ref[...]                  # (SLAB_ROWS, HID_PAD) packed params + x
    w1_row = p[0:1, :]                 # (1, HID_PAD)  Linear(1,50) weight (padded)
    b1_row = p[1:2, :]                 # (1, HID_PAD)  Linear(1,50) bias   (padded)
    w2_row = p[2:3, :]                 # (1, HID_PAD)  Linear(50,1) weight (padded)
    b2     = p[3:4, 0:1]               # (1, 1)        Linear(50,1) bias
    x      = p[4:4 + B, 0:1]           # (B, 1)        inputs, batch along sublanes

    # hidden = x @ W1^T + b1  ==  x * w1_row + b1_row   (K=1 => pure VPU MAC)
    h = x * w1_row + b1_row            # (B, HID_PAD)
    # quadratic activation: h ** 4
    h2 = h * h
    h4 = h2 * h2
    # out = h4 @ W2^T + b2 == lane-reduce(h4 * w2_row) + b2  (N=1 => XLU reduce;
    # deliberately NOT jnp.dot -- an N=1,K=128 MXU matmul would only add
    # push/pop latency while wasting the systolic array)
    out = jnp.sum(h4 * w2_row, axis=-1, keepdims=True)   # (B, 1)
    o_ref[...] = out + b2


def pack_params(w1, b1, w2, b2):
    """Pack PyTorch-shaped params (w1:(50,1), b1:(50,), w2:(1,50), b2:(1,))
    into a single lane-padded (4, 128) f32 slab.  Call ONCE at init/update time."""
    params = jnp.zeros((4, HID_PAD), dtype=jnp.float32)
    params = params.at[0, :HID].set(w1[:, 0].astype(jnp.float32))   # w1 row
    params = params.at[1, :HID].set(b1.astype(jnp.float32))         # b1
    params = params.at[2, :HID].set(w2[0, :].astype(jnp.float32))   # w2 row
    params = params.at[3, 0].set(b2[0].astype(jnp.float32))         # b2 scalar
    return params


@jax.jit
def quadnn_forward(x, packed_params):
    """x: (B, 1) f32; packed_params: (4, HID_PAD) f32 from pack_params()."""
    # Merge x into the params slab -> exactly one operand DMA into the kernel.
    # (Tiny fused pad+concat inside the same jit; cheaper than a 2nd DMA wait.)
    x_rows = jnp.zeros((B, HID_PAD), dtype=jnp.float32)
    x_rows = x_rows.at[:, 0].set(x[:, 0].astype(jnp.float32))
    slab = jnp.concatenate([packed_params, x_rows], axis=0)   # (SLAB_ROWS, HID_PAD)

    full = lambda shape: pl.BlockSpec(shape, lambda: tuple(0 for _ in shape))
    return pl.pallas_call(
        quadnn_kernel,
        out_shape=jax.ShapeDtypeStruct((B, OUT_DIM), jnp.float32),
        grid=(),
        in_specs=[full((SLAB_ROWS, HID_PAD))],
        out_specs=full((B, OUT_DIM)),
    )(slab)


if __name__ == "__main__":
    key = jax.random.PRNGKey(0)
    kx, k1, k2, k3, k4 = jax.random.split(key, 5)

    # Deterministic inputs / "parameters" mimicking nn.Linear init bounds.
    x = jax.random.normal(kx, (B, IN_DIM), dtype=jnp.float32)
    w1 = jax.random.uniform(k1, (HID, IN_DIM), minval=-1.0, maxval=1.0, dtype=jnp.float32)
    b1 = jax.random.uniform(k2, (HID,), minval=-1.0, maxval=1.0, dtype=jnp.float32)
    bound2 = 1.0 / jnp.sqrt(float(HID))
    w2 = jax.random.uniform(k3, (OUT_DIM, HID), minval=-bound2, maxval=bound2, dtype=jnp.float32)
    b2 = jax.random.uniform(k4, (OUT_DIM,), minval=-bound2, maxval=bound2, dtype=jnp.float32)

    # Pack params once (hoisted out of the per-call path).
    packed = pack_params(w1, b1, w2, b2)
    jax.block_until_ready(packed)

    out = quadnn_forward(x, packed)
    jax.block_until_ready(out)

    # Reference check in plain JAX (matches PyTorch QuadNN.forward; ReLU is
    # defined in the module but unused in its forward).
    ref = (x @ w1.T + b1) ** 4 @ w2.T + b2
    assert out.shape == (B, OUT_DIM)
    assert jnp.allclose(out, ref, rtol=1e-5, atol=1e-5)
    print("KERNEL_OK")
</pallas_src>

<mosaic_0001>
module attributes {stable_mosaic.version = 11 : i64} {
  func.func @quadnn_kernel(%arg0: memref<12x128xf32, #tpu.memory_space<vmem>>, %arg1: memref<8x1xf32, #tpu.memory_space<vmem>>) attributes {dimension_semantics = [], scalar_prefetch = 0 : i64, scratch_operands = 0 : i64, tpu.core_type = #tpu.core_type<tc>} {
    %c0 = arith.constant 0 : index
    %c0_0 = arith.constant 0 : index
    %0 = vector.load %arg0[%c0, %c0_0] : memref<12x128xf32, #tpu.memory_space<vmem>>, vector<12x128xf32>
    %1 = vector.extract_strided_slice %0 {offsets = [0, 0], sizes = [1, 128], strides = [1, 1]} : vector<12x128xf32> to vector<1x128xf32>
    %2 = vector.extract_strided_slice %0 {offsets = [1, 0], sizes = [1, 128], strides = [1, 1]} : vector<12x128xf32> to vector<1x128xf32>
    %3 = vector.extract_strided_slice %0 {offsets = [2, 0], sizes = [1, 128], strides = [1, 1]} : vector<12x128xf32> to vector<1x128xf32>
    %4 = vector.extract_strided_slice %0 {offsets = [3, 0], sizes = [1, 1], strides = [1, 1]} : vector<12x128xf32> to vector<1x1xf32>
    %5 = vector.extract_strided_slice %0 {offsets = [4, 0], sizes = [8, 1], strides = [1, 1]} : vector<12x128xf32> to vector<8x1xf32>
    %6 = vector.broadcast %5 : vector<8x1xf32> to vector<8x128xf32>
    %7 = vector.broadcast %1 : vector<1x128xf32> to vector<8x128xf32>
    %8 = arith.mulf %6, %7 : vector<8x128xf32>
    %9 = vector.broadcast %2 : vector<1x128xf32> to vector<8x128xf32>
    %10 = arith.addf %8, %9 : vector<8x128xf32>
    %11 = arith.mulf %10, %10 : vector<8x128xf32>
    %12 = arith.mulf %11, %11 : vector<8x128xf32>
    %13 = vector.broadcast %3 : vector<1x128xf32> to vector<8x128xf32>
    %14 = arith.mulf %12, %13 : vector<8x128xf32>
    %cst = arith.constant dense<0.000000e+00> : vector<8xf32>
    %15 = vector.multi_reduction <add>, %14, %cst [1] : vector<8x128xf32> to vector<8xf32>
    %16 = vector.shape_cast %15 : vector<8xf32> to vector<8x1xf32>
    %17 = vector.broadcast %4 : vector<1x1xf32> to vector<8x1xf32>
    %18 = arith.addf %16, %17 : vector<8x1xf32>
    %c0_1 = arith.constant 0 : index
    %c0_2 = arith.constant 0 : index
    %19 = vector.load %arg1[%c0_1, %c0_2] : memref<8x1xf32, #tpu.memory_space<vmem>>, vector<8x1xf32>
    tpu.vector_store %arg1[%c0_1, %c0_2], %18 {strides = array<i32>} : memref<8x1xf32, #tpu.memory_space<vmem>>, vector<8x1xf32>,
    return
  }
}

</mosaic_0001>

<bundles_post_ra>
// kernel: quadnn_forward.1
= control target key start
LH: loop header
LB: loop body
LE: loop exit
PB: predicated region body
PF: predicated region fallthrough
CT: control target
= control target key end

     0   :  { %v66_v0 = vmov 0   ;;  %v20_v3 = vlaneseq  ;;  %vm42_vm0 = vcmask 1047556   ;;  %vm46_vm1 = vcmask 1043456   ;;  %s89_s0 = inlined_call_operand.vmem [shape: f32[12,128], index: 0, kind: input, shape index: {}]   ;;  %s90_s1 = inlined_call_operand.vmem [shape: f32[8,1], index: 1, kind: output, shape index: {}]  }
   0x1   :  { %65 = vset.pattern.permute.xlu0 %v66_v0  ;;  %v8_v1 = vld [vmem:[%s89_s0] sm:$0xff]  ;;  %v9_v2 = vld [vmem:[%s89_s0 + $0x8] sm:$0xf]  ;;  %vm56_vm2 = vcmask 7172   ;;  %vm58_vm3 = vcmask 3072  }
   0x2   :  { %12 = vperm.xlu0 %65, %v8_v1   ;;  %v21_v4 = vshrl.u32 %v20_v3, 7 }
   0x4   :  { %v52_v5 = vsub.s32 3, %v21_v4  ;;  %v22_v7 = vsub.s32 0, %v21_v4  ;;  %v28_v8 = vsub.s32 1, %v21_v4  ;;  %v38_v13 = vsub.s32 2, %v21_v4 }
   0x6   :  { %17 = vperm.xlu0 %65, %v9_v2   ;;  %v53_v6 = vrot.slane %v8_v1, %v52_v5  ;;  %v23_v9 = vrot.slane %v8_v1, %v22_v7  ;;  %v29_v10 = vrot.slane %v8_v1, %v28_v8  ;;  %v39_v18 = vrot.slane %v8_v1, %v38_v13 }
  0x81   :  { %v13_v11 = vpop.permute.xlu0 %12 }
  0x82   :  { %v24_v12 = vmul.f32 %v23_v9, %v13_v11 }
  0x84   :  { %v30_v14 = vadd.f32 %v29_v10, %v24_v12 }
  0x85   :  { %v18_v15 = vpop.permute.xlu0 %17 }
  0x86   :  { %v32_v16 = vmul.f32 %v30_v14, %v30_v14  ;;  %v25_v17 = vmul.f32 %v23_v9, %v18_v15 }
  0x88   :  { %v34_v19 = vmul.f32 %v32_v16, %v32_v16  ;;  %v31_v20 = vadd.f32 %v29_v10, %v25_v17 }
  0x8a   :  { %v33_v21 = vmul.f32 %v31_v20, %v31_v20  ;;  %v40_v22 = vmul.f32 %v39_v18, %v34_v19 }
  0x8c   :  { %v35_v23 = vmul.f32 %v33_v21, %v33_v21  ;;  %v43_v24 = vsel %vm42_vm0, %v40_v22, 0.0 }
  0x8d   :  { %44 = vadd.xlane.f32.xlu1 %v43_v24 }
  0x8e   :  { %v41_v25 = vmul.f32 %v39_v18, %v35_v23 }
  0x90   :  { %v47_v26 = vsel %vm46_vm1, %v41_v25, 0.0 }
  0x91   :  { %48 = vadd.xlane.f32.xlu1 %v47_v26 }
 0x11a   :  { %v45_v27 = vpop.xlane.xlu1 %44 }
 0x11b   :  { %v54_v28 = vadd.f32 %v53_v6, %v45_v27 }
 0x11d   :  { %57 = vst.msk [vmem:[%s90_s1 - $0x4] sm:$0xf0] %vm56_vm2, %v54_v28 }
 0x11e   :  { %v49_v29 = vpop.xlane.xlu1 %48 }
 0x11f   :  { %v55_v30 = vadd.f32 %v53_v6, %v49_v29 }
 0x121   :  { %59 = vst.msk [vmem:[%s90_s1 + $0x4] sm:$0xf] %vm58_vm3, %v55_v30 }

</bundles_post_ra>
